<compile_context>
chip_gen: v6e
topology: v6e:2x2x1
jax: 0.10.0
libtpu: 0.0.40
codegen_flags: <defaults>
</compile_context>

<pallas_src>
import jax
import jax.numpy as jnp
import numpy as np
from jax.experimental import pallas as pl
from jax.experimental.pallas import tpu as pltpu

LANE = 128          # TPU vreg lane width
MAX_BLOCK_ROWS = 1024  # 1024 x 128 f32 = 512 KiB per block; double-buffered
                       # in+out < 2.5 MiB -> fits v5e/v6e/v7x scoped VMEM.


def _copy_kernel(x_ref, o_ref):
    # Reference forward() does no compute; element-wise pass-through of the
    # current (block_rows, 128) tile.
    o_ref[...] = x_ref[...]


@jax.jit
def googlenet_forward(x):
    """Pallas equivalent of GoogLeNet.forward from freshness.py.

    x: (N, C, H, W) float32 (PyTorch NCHW input).
    Returns the identity of x computed via a tiled, lane-dense Pallas copy.
    # TODO(synk): the reference forward() body is `pass` (returns None) and no
    # layers exist in __init__, so there is no real network to translate.
    """
    orig_shape = x.shape
    total = x.size

    # Lane-dense reshape: last dim a multiple of 128 whenever possible so
    # stores are full-width vst (not masked partial stores).
    if total % LANE == 0:
        rows = total // LANE
        x2d = x.reshape(rows, LANE)
    else:
        # Fallback for awkward sizes: keep original last dim, single block.
        x2d = x.reshape(-1, orig_shape[-1])
        rows = x2d.shape[0]

    lanes = x2d.shape[1]

    # Tile the sublane (row) axis.  block_rows is either the full row count
    # (small inputs, full-array exemption from the (8,128) rule) or a
    # multiple-of-8 tile small enough to double-buffer on every generation.
    if lanes % LANE == 0:
        block_rows = min(rows, MAX_BLOCK_ROWS)
    else:
        block_rows = rows
    grid = (pl.cdiv(rows, block_rows),)

    nbytes = total * x.dtype.itemsize

    out2d = pl.pallas_call(
        _copy_kernel,
        out_shape=jax.ShapeDtypeStruct(x2d.shape, x2d.dtype),
        grid=grid,
        in_specs=[pl.BlockSpec((block_rows, lanes), lambda i: (i, 0))],
        out_specs=pl.BlockSpec((block_rows, lanes), lambda i: (i, 0)),
        # Zero-compute op: let XLA alias the input buffer to the output.
        input_output_aliases={0: 0},
        compiler_params=pltpu.CompilerParams(
            dimension_semantics=("parallel",),
        ),
        cost_estimate=pl.CostEstimate(
            flops=0, transcendentals=0, bytes_accessed=2 * nbytes
        ),
    )(x2d)

    return out2d.reshape(orig_shape)


if __name__ == "__main__":
    key = jax.random.PRNGKey(0)
    # Small NCHW input consistent with a conv-net style forward signature.
    x = jax.random.normal(key, (2, 4, 16, 16), dtype=jnp.float32)

    # Snapshot the expected values before the call (robust to any buffer
    # donation/aliasing effects).
    expected = np.asarray(jax.device_get(x))

    y = googlenet_forward(x)
    y = jax.block_until_ready(y)

    # Sanity: identity pass-through must match the input exactly.
    assert y.shape == x.shape
    assert np.array_equal(np.asarray(jax.device_get(y)), expected)

    print("KERNEL_OK")
</pallas_src>

<mosaic_0001>
module attributes {stable_mosaic.version = 11 : i64} {
  func.func @_copy_kernel(%arg0: i32, %arg1: memref<16x128xf32, #tpu.memory_space<vmem>>, %arg2: memref<16x128xf32, #tpu.memory_space<vmem>>) attributes {dimension_semantics = [#tpu.dimension_semantics<parallel>], iteration_bounds = array<i64: 1>, scalar_prefetch = 0 : i64, scratch_operands = 0 : i64, tpu.core_type = #tpu.core_type<tc>, window_params = [{transform_indices = @transform_0, window_bounds = array<i64: 16, 128>}, {transform_indices = @transform_1, window_bounds = array<i64: 16, 128>}]} {
    %c0 = arith.constant 0 : index
    %c0_0 = arith.constant 0 : index
    %0 = vector.load %arg1[%c0, %c0_0] : memref<16x128xf32, #tpu.memory_space<vmem>>, vector<16x128xf32>
    %c0_1 = arith.constant 0 : index
    %c0_2 = arith.constant 0 : index
    %1 = vector.load %arg2[%c0_1, %c0_2] : memref<16x128xf32, #tpu.memory_space<vmem>>, vector<16x128xf32>
    tpu.vector_store %arg2[%c0_1, %c0_2], %0 {strides = array<i32>} : memref<16x128xf32, #tpu.memory_space<vmem>>, vector<16x128xf32>,
    return
  }
  func.func @transform_0(%arg0: i32) -> (i32, i32) {
    %c0_i32 = arith.constant 0 : i32
    %c0_i32_0 = arith.constant 0 : i32
    return %arg0, %c0_i32 : i32, i32
  }
  func.func @transform_1(%arg0: i32) -> (i32, i32) {
    %c0_i32 = arith.constant 0 : i32
    %c0_i32_0 = arith.constant 0 : i32
    return %arg0, %c0_i32 : i32, i32
  }
}

</mosaic_0001>

<bundles_post_ra>
// kernel: googlenet_forward.1
= control target key start
LH: loop header
LB: loop body
LE: loop exit
PB: predicated region body
PF: predicated region fallthrough
CT: control target
= control target key end

     0   :  { %s38_s0 = inlined_call_operand.vmem [shape: f32[16,128], index: 0, kind: input, shape index: {}, may-alias: {0,1}]   ;;  %s39_s1 = inlined_call_operand.vmem [shape: f32[16,128], index: 1, kind: output, shape index: {}, may-alias: {0,1}]  }
   0x1   :  { %v8_v0 = vld [vmem:[%s38_s0] sm:$0xff]  ;;  %v9_v1 = vld [vmem:[%s38_s0 + $0x8] sm:$0xff] }
   0x2   :  { %10 = vst [vmem:[%s39_s1] sm:$0xff] %v8_v0  ;;  %11 = vst [vmem:[%s39_s1 + $0x8] sm:$0xff] %v9_v1 }

</bundles_post_ra>
